<compile_context>
chip_gen: v5e
topology: v5e:2x2
jax: 0.10.0
libtpu: 0.0.40
codegen_flags: <defaults>
</compile_context>

<pallas_src>
import jax
import jax.numpy as jnp
from jax.experimental import pallas as pl
from jax.experimental.pallas import tpu as pltpu


ROW_PACK = 8           # logical rows packed per physical (lane-dense) row
TARGET_STEPS = 8       # aim for >= 8 grid steps (>= 4 per TensorCore on v7x)
MAX_TILE_PHYS = 2048   # 2048 packed rows = 16384 logical rows; at d_model=48 the
                       # out tile is 3 MiB (~8 MiB total double-buffered incl. x):
                       # fits every generation's scoped-VMEM default, no flags.


def _round_up(a, b):
    return ((a + b - 1) // b) * b


def _make_kernel(d, wide, lpad_tile, lpad_row, lpad_col):
    """Builds the tile kernel with all lpad placement indices folded as statics."""

    def kernel(x_ref, w_ref, lpad_ref, out_ref):
        # phase[r, k*D + c] = 1500 * x[8r+k, coord(c)] * inv_freq(c) + offset(c)
        phase = jnp.dot(x_ref[...], w_ref[...], preferred_element_type=jnp.float32)
        # cos columns ride on the +pi/2 offset row, so one sin covers everything.
        # TODO(synk): if a bundle dump shows the VALU saturated (v6e/v7x once no
        # longer write-bound), share one range reduction between each sin/cos
        # column pair instead of two independent jnp.sin evaluations.
        out_ref[...] = jnp.sin(phase).astype(out_ref.dtype)

        # Blend the learned pad row into the D-wide lane window of the packed
        # row that owns logical row N.  All indices are static Python ints and
        # the store is a full-width (1, wide) read-modify-write, so no narrow /
        # lane-unaligned store is emitted.
        @pl.when(pl.program_id(0) == lpad_tile)
        def _():
            lane = jax.lax.broadcasted_iota(jnp.int32, (1, wide), 1)
            in_win = (lane >= lpad_col) & (lane < lpad_col + d)
            row = out_ref[lpad_row:lpad_row + 1, :]
            out_ref[lpad_row:lpad_row + 1, :] = jnp.where(in_win, lpad_ref[...], row)

    return kernel


def d3_positional_encoder5(x, lpad, d_model, *, out_dtype=jnp.float32):
    """JAX/Pallas equivalent of D3PositionalEncoder5.forward(x, n_padding=0).

    x    : (N, 3) float
    lpad : (1, d_model) float
    returns (N + 1, d_model) out_dtype, row N == lpad.
    (out_dtype=jnp.bfloat16 halves HBM write bytes on v5e/v6e if downstream
     tolerates it; compute stays in f32 and only the final store is cast.)
    """
    assert x.shape[1] == 3
    n_seg = d_model // 6
    D = 6 * n_seg
    # The torch module only row-concats lpad successfully when d_model % 6 == 0.
    assert D == d_model, "d_model must be divisible by 6 for the row-concat to be valid"
    N = x.shape[0]
    wide = ROW_PACK * D

    # ---- host-side constant folding -----------------------------------------
    col = jnp.arange(D)
    i_idx = (col // 6).astype(jnp.float32)                 # frequency segment index
    j_idx = col % 6                                        # position inside the 6-wide segment
    scale = 1500.0 / (10000.0 ** (6.0 * i_idx / d_model))  # (D,) 1500 * inv_freq
    coord = j_idx % 3                                      # which of x/y/z this column reads
    sel = jax.nn.one_hot(coord, 3, dtype=jnp.float32).T * scale[None, :]          # (3, D)
    offset = jnp.where(j_idx >= 3, jnp.pi / 2.0, 0.0).astype(jnp.float32)[None, :]  # (1, D)
    w = jnp.concatenate([sel, offset], axis=0)             # (4, D)
    # Block-diagonal replication: 8 logical rows produced per packed physical row.
    w_big = jnp.kron(jnp.eye(ROW_PACK, dtype=jnp.float32), w)   # (32, 8*D)

    # ---- row-packed, N-derived tiling ---------------------------------------
    n_log = N + 1                                          # +1 for the lpad row
    n_phys_min = pl.cdiv(n_log, ROW_PACK)
    tn_phys = min(MAX_TILE_PHYS, _round_up(pl.cdiv(n_phys_min, TARGET_STEPS), 8))
    n_phys = _round_up(n_phys_min, tn_phys)
    n_log_pad = n_phys * ROW_PACK
    grid = n_phys // tn_phys

    # Augment x with a ones column (the phase offset rides on it) and pad the
    # row count in a single jnp.pad; then reshape contiguously to (n_phys, 32).
    x4 = jnp.pad(x.astype(jnp.float32), ((0, n_log_pad - N), (0, 1)),
                 constant_values=((0.0, 0.0), (0.0, 1.0)))
    x_packed = x4.reshape(n_phys, 4 * ROW_PACK)

    # lpad, pre-placed at its packed lane window (static placement).
    lpad_phys = N // ROW_PACK
    lpad_col = (N % ROW_PACK) * D
    lpad_tile = lpad_phys // tn_phys
    lpad_row = lpad_phys % tn_phys
    lpad_slot = jnp.zeros((1, wide), out_dtype)
    lpad_slot = lpad_slot.at[:, lpad_col:lpad_col + D].set(lpad.astype(out_dtype))

    kernel = _make_kernel(D, wide, lpad_tile, lpad_row, lpad_col)
    out_packed = pl.pallas_call(
        kernel,
        out_shape=jax.ShapeDtypeStruct((n_phys, wide), out_dtype),
        grid=(grid,),
        in_specs=[
            pl.BlockSpec((tn_phys, 4 * ROW_PACK), lambda i: (i, 0)),  # streamed over rows
            pl.BlockSpec((4 * ROW_PACK, wide), lambda i: (0, 0)),     # VMEM-resident weights
            pl.BlockSpec((1, wide), lambda i: (0, 0)),                # VMEM-resident lpad
        ],
        out_specs=pl.BlockSpec((tn_phys, wide), lambda i: (i, 0)),
        compiler_params=pltpu.CompilerParams(
            dimension_semantics=("parallel",),                        # 2-TC sharding on v7x
        ),
    )(x_packed, w_big, lpad_slot)

    out = out_packed.reshape(n_log_pad, D)   # contiguous reshape -> free (bitcast)
    if n_log_pad == n_log:
        return out                           # zero-copy path (N+1 is 8*tile aligned)
    # TODO(synk): this slice is the one remaining full-result copy; it only
    # triggers when N+1 is not a multiple of ROW_PACK*tile. Callers that can
    # accept 8-row-aligned N (or the padded buffer) get the zero-copy path.
    return out[:n_log]


def _reference(x, lpad, d_model):
    """Pure-JAX reference mirroring the torch loop, for a correctness check."""
    n_seg = d_model // 6
    x = x * 1500.0
    cols = []
    for i in range(n_seg):
        f = 10000.0 ** (6.0 * i / d_model)
        t = jnp.stack(
            [jnp.sin(x[:, 0] / f), jnp.sin(x[:, 1] / f), jnp.sin(x[:, 2] / f),
             jnp.cos(x[:, 0] / f), jnp.cos(x[:, 1] / f), jnp.cos(x[:, 2] / f)],
            axis=1,
        )
        cols.append(t)
    xs = jnp.concatenate(cols, axis=1)
    return jnp.concatenate([xs, lpad], axis=0)


if __name__ == "__main__":
    d_model = 48                 # small, divisible by 6 (n_seg = 8)
    key = jax.random.PRNGKey(0)
    kx1, kx2, kp = jax.random.split(key, 3)
    lpad = jax.random.uniform(kp, (1, d_model), dtype=jnp.float32)   # torch.rand((1, d_model))

    # Case 1: N + 1 is 8-aligned -> pallas output IS the module output (zero-copy path).
    N1 = 63
    x1 = jax.random.uniform(kx1, (N1, 3), dtype=jnp.float32)
    out1 = jax.block_until_ready(d3_positional_encoder5(x1, lpad, d_model))
    ref1 = _reference(x1, lpad, d_model)
    assert out1.shape == (N1 + 1, d_model), out1.shape
    err1 = float(jnp.abs(out1 - ref1).max())
    # cos(t) -> sin(t + pi/2) + pre-folded constants add ~1 ulp of phase rounding
    # at |phase| ~ 1500, so compare with a slightly relaxed tolerance.
    assert jnp.allclose(out1, ref1, atol=2e-3, rtol=1e-3), err1

    # Case 2: unaligned N (lpad lands at lane offset 0 of a later packed row; sliced path).
    N2 = 8
    x2 = jax.random.uniform(kx2, (N2, 3), dtype=jnp.float32)
    out2 = jax.block_until_ready(d3_positional_encoder5(x2, lpad, d_model))
    ref2 = _reference(x2, lpad, d_model)
    assert out2.shape == (N2 + 1, d_model), out2.shape
    err2 = float(jnp.abs(out2 - ref2).max())
    assert jnp.allclose(out2, ref2, atol=2e-3, rtol=1e-3), err2

    print("KERNEL_OK")
</pallas_src>

<mosaic_0001>
module attributes {stable_mosaic.version = 11 : i64} {
  func.func @kernel(%arg0: i32, %arg1: memref<8x32xf32, #tpu.memory_space<vmem>>, %arg2: memref<32x384xf32, #tpu.memory_space<vmem>>, %arg3: memref<1x384xf32, #tpu.memory_space<vmem>>, %arg4: memref<8x384xf32, #tpu.memory_space<vmem>>) attributes {dimension_semantics = [#tpu.dimension_semantics<parallel>], iteration_bounds = array<i64: 1>, scalar_prefetch = 0 : i64, scratch_operands = 0 : i64, tpu.core_type = #tpu.core_type<tc>, window_params = [{transform_indices = @transform_0, window_bounds = array<i64: 8, 32>}, {pipeline_mode = #tpu.pipeline_mode<synchronous>, transform_indices = @transform_1, window_bounds = array<i64: 32, 384>}, {pipeline_mode = #tpu.pipeline_mode<synchronous>, transform_indices = @transform_2, window_bounds = array<i64: 1, 384>}, {transform_indices = @transform_3, window_bounds = array<i64: 8, 384>}]} {
    %c0 = arith.constant 0 : index
    %c0_0 = arith.constant 0 : index
    %0 = vector.load %arg1[%c0, %c0_0] : memref<8x32xf32, #tpu.memory_space<vmem>>, vector<8x32xf32>
    %c0_1 = arith.constant 0 : index
    %c0_2 = arith.constant 0 : index
    %1 = vector.load %arg2[%c0_1, %c0_2] : memref<32x384xf32, #tpu.memory_space<vmem>>, vector<32x384xf32>
    %cst = arith.constant dense<0.000000e+00> : vector<8x384xf32>
    %2 = tpu.matmul %0, %1, %cst {dimension_numbers = #tpu.dot_dimension_numbers<[1], [0], [0], [1], [0, 0, 1, 1], [], []>} : vector<8x32xf32>, vector<32x384xf32>, vector<8x384xf32> -> vector<8x384xf32>
    %3 = math.sin %2 : vector<8x384xf32>
    %c0_3 = arith.constant 0 : index
    %c0_4 = arith.constant 0 : index
    %4 = vector.load %arg4[%c0_3, %c0_4] : memref<8x384xf32, #tpu.memory_space<vmem>>, vector<8x384xf32>
    tpu.vector_store %arg4[%c0_3, %c0_4], %3 {strides = array<i32>} : memref<8x384xf32, #tpu.memory_space<vmem>>, vector<8x384xf32>,
    %c0_i32 = arith.constant 0 : i32
    %5 = arith.cmpi eq, %arg0, %c0_i32 : i32
    %6 = arith.extui %5 : i1 to i32
    %c0_i32_5 = arith.constant 0 : i32
    %7 = arith.cmpi ne, %6, %c0_i32_5 : i32
    scf.if %7 {
      %8 = tpu.iota {dimensions = array<i32: 1>} : vector<1x384xi32>
      %c336_i32 = arith.constant 336 : i32
      %9 = vector.broadcast %c336_i32 : i32 to vector<1x384xi32>
      %10 = arith.cmpi sge, %8, %9 : vector<1x384xi32>
      %c384_i32 = arith.constant 384 : i32
      %11 = vector.broadcast %c384_i32 : i32 to vector<1x384xi32>
      %12 = arith.cmpi slt, %8, %11 : vector<1x384xi32>
      %13 = arith.andi %10, %12 : vector<1x384xi1>
      %c7 = arith.constant 7 : index
      %c0_6 = arith.constant 0 : index
      %14 = vector.load %arg4[%c7, %c0_6] : memref<8x384xf32, #tpu.memory_space<vmem>>, vector<1x384xf32>
      %c0_7 = arith.constant 0 : index
      %c0_8 = arith.constant 0 : index
      %15 = vector.load %arg3[%c0_7, %c0_8] : memref<1x384xf32, #tpu.memory_space<vmem>>, vector<1x384xf32>
      %16 = arith.select %13, %15, %14 : vector<1x384xi1>, vector<1x384xf32>
      %c7_9 = arith.constant 7 : index
      %c0_10 = arith.constant 0 : index
      %17 = vector.load %arg4[%c7_9, %c0_10] : memref<8x384xf32, #tpu.memory_space<vmem>>, vector<1x384xf32>
      tpu.vector_store %arg4[%c7_9, %c0_10], %16 {strides = array<i32>} : memref<8x384xf32, #tpu.memory_space<vmem>>, vector<1x384xf32>,
    } else {
    }
    return
  }
  func.func @transform_0(%arg0: i32) -> (i32, i32) {
    %c0_i32 = arith.constant 0 : i32
    %c0_i32_0 = arith.constant 0 : i32
    return %arg0, %c0_i32 : i32, i32
  }
  func.func @transform_1(%arg0: i32) -> (i32, i32) {
    %c0_i32 = arith.constant 0 : i32
    %c0_i32_0 = arith.constant 0 : i32
    %c0_i32_1 = arith.constant 0 : i32
    return %c0_i32, %c0_i32_0 : i32, i32
  }
  func.func @transform_2(%arg0: i32) -> (i32, i32) {
    %c0_i32 = arith.constant 0 : i32
    %c0_i32_0 = arith.constant 0 : i32
    %c0_i32_1 = arith.constant 0 : i32
    return %c0_i32, %c0_i32_0 : i32, i32
  }
  func.func @transform_3(%arg0: i32) -> (i32, i32) {
    %c0_i32 = arith.constant 0 : i32
    %c0_i32_0 = arith.constant 0 : i32
    return %arg0, %c0_i32 : i32, i32
  }
}

</mosaic_0001>

<bundles_post_ra>
// kernel: tpu_custom_call.1
= control target key start
LH: loop header
LB: loop body
LE: loop exit
PB: predicated region body
PF: predicated region fallthrough
CT: control target
= control target key end

     0   :  { %8 = vsyncpa [#allocation3], 0  ;;  %s1151_s0 = inlined_call_operand.hbm [shape: f32[8,32], index: 0, kind: input, shape index: {}]   ;;  %s1152_s1 = inlined_call_operand.hbm [shape: f32[32,384], index: 1, kind: input, shape index: {}]   ;;  %s1153_s2 = inlined_call_operand.hbm [shape: f32[1,384], index: 2, kind: input, shape index: {}]   ;;  %s1154_s3 = inlined_call_operand.hbm [shape: f32[8,384], index: 3, kind: output, shape index: {}]  }
   0x1   :  { %9 = vsyncpa [#allocation6], 0  ;;  %s26_s14 = sshll.u32 %s1152_s1, 4  ;;  %s27_s14 = int_to_ptr.hbm [resolvable:$true] %s26_s14 }
   0x2   :  { %10 = vsyncpa [#allocation4], 0  ;;  %s801_s15 = smov [#allocation5]   ;;  %s16_s19 = sshll.u32 %s1151_s0, 4  ;;  %s17_s19 = int_to_ptr.hbm [resolvable:$true] %s16_s19 }
   0x3   :  { %s28_s16 = sshll.u32 %s801_s15, 4  ;;  %s802_s20 = smov 384   ;;  %s29_s16 = int_to_ptr.vmem [resolvable:$true] %s28_s16 }
   0x4   :  { %s803_s21 = smov 24   ;;  %s804_s22 = smov [#allocation2]  }
   0x5   :  { %34 = dma.hbm_to_vmem [thread:$0]  %s27_s14, 1536, %s29_s16, [#allocation6], %s802_s20, %s802_s20, %s803_s21  }
   0x6   :  { %s18_s23 = sshll.u32 %s804_s22, 4  ;;  %s40_s26 = sshll.u32 %s1153_s2, 4  ;;  %s19_s23 = int_to_ptr.vmem [resolvable:$true] %s18_s23  ;;  %s41_s26 = int_to_ptr.hbm [resolvable:$true] %s40_s26 }
   0x7   :  { %21 = dma.hbm_to_vmem [thread:$0]  %s17_s19, 128, %s19_s23, [#allocation3]  }
   0x8   :  { %s805_s1 = smov [#allocation7]  }
   0x9   :  { %s42_s27 = sshll.u32 %s805_s1, 4  ;;  %s43_s27 = int_to_ptr.vmem [resolvable:$true] %s42_s27 }
   0xa   :  { %45 = dma.hbm_to_vmem [thread:$0]  %s41_s26, 48, %s43_s27, [#allocation6]  }
   0xb   :  { %795 = dma.done.wait [#allocation3], 128  }
   0xc   :  { %796 = vsyncadd [#allocation3], 4294967168 }
   0xd   :  { %797 = dma.done.wait [#allocation6], 1584  }
   0xe   :  { %798 = vsyncadd [#allocation6], 4294965712  ;;  %v68_v0 = vld [vmem:[#allocation5 + $0x48] sm:$0xff]  ;;  %v69_v1 = vld [vmem:[#allocation5 + $0x50] sm:$0xff]  ;;  %vm71_vm0 = vcmask 261120   ;;  %s813_s0 = smov [#allocation8]  }
   0xf   :  { %v70_v2 = vld [vmem:[#allocation5 + $0x58] sm:$0xff]  ;;  %87 = vmatpush.msra.mxu0 %v68_v0  ;;  %107 = vmatpush.msra.mxu1 %v69_v1  ;;  %v65_v3 = vld [vmem:[#allocation5 + $0x30] sm:$0xff]  ;;  %v67_v5 = vld [vmem:[#allocation5 + $0x40] sm:$0xff]  ;;  %v806_v36 = vmov 683565275   ;;  %s661_s2 = sshll.u32 %s813_s0, 4  ;;  %s662_s2 = int_to_ptr.vmem [resolvable:$true] %s661_s2 }
  0x10   :  { %v66_v4 = vld [vmem:[#allocation5 + $0x38] sm:$0xff]  ;;  %127 = vmatpush.msra.mxu2 %v70_v2  ;;  %v63_v7 = vld [vmem:[#allocation5 + $0x20] sm:$0xff]  ;;  %v64_v8 = vld [vmem:[#allocation5 + $0x28] sm:$0xff]  ;;  %v807_v38 = vmov 2475754826   ;;  %s663_s30 = sshll.u32 %s1154_s3, 4  ;;  %s664_s30 = int_to_ptr.hbm [resolvable:$true] %s663_s30 }
  0x11   :  { %v62_v6 = vld [vmem:[#allocation5 + $0x18] sm:$0xff]  ;;  %88 = vmatpush.msra.mxu0 %v65_v3  ;;  %108 = vmatpush.msra.mxu1 %v66_v4  ;;  %v59_v9 = vld [vmem:[#allocation5] sm:$0xff]  ;;  %v60_v10 = vld [vmem:[#allocation5 + $0x8] sm:$0xff]  ;;  %v808_v40 = vmov 2131351028  }
  0x12   :  { %128 = vmatpush.msra.mxu2 %v67_v5  ;;  %v61_v11 = vld [vmem:[#allocation5 + $0x10] sm:$0xff]  ;;  %v58_v12 = vld [vmem:[#allocation2] sm:$0xff]  ;;  %v809_v42 = vmov 2102212464   ;;  %v810_v44 = vmov 920167782  }
  0x13   :  { %89 = vmatpush.msra.mxu0 %v62_v6  ;;  %109 = vmatpush.msra.mxu1 %v63_v7  ;;  %v811_v54 = vmov 1326507024  }
  0x14   :  { %129 = vmatpush.msra.mxu2 %v64_v8 }
  0x15   :  { %90 = vmatpush.msra.mxu0 %v59_v9  ;;  %110 = vmatpush.msra.mxu1 %v60_v10 }
  0x16   :  { %130 = vmatpush.msra.mxu2 %v61_v11  ;;  %674 = vmatmul.msk.f32.vlgmr.msra.gmra.mxu0 %vm71_vm0, %v58_v12 }
  0x17   :  { %675 = vmatmul.msk.f32.vlgmr.msra.gmra.mxu1 %vm71_vm0, %v58_v12  ;;  %676 = vmatmul.msk.f32.vlgmr.msra.gmra.mxu2 %vm71_vm0, %v58_v12 }
  0x93   :  { %v843_v13 = vpop.f32.mrf.mxu0 }
  0x94   :  { %v135_v14 = vand.u32 2147483647, %v843_v13  ;;  %v138_v15 = vand.u32 2139095040, %v843_v13  ;;  %v847_v16 = vpop.f32.mrf.mxu1 }
  0x95   :  { %v290_v17 = vand.u32 2147483647, %v847_v16  ;;  %v293_v18 = vand.u32 2139095040, %v847_v16 }
  0x96   :  { %v139_v19 = vshrl.u32 %v138_v15, 23  ;;  %v142_v20 = vand.u32 8388607, %v135_v14 }
  0x97   :  { %v294_v21 = vshrl.u32 %v293_v18, 23  ;;  %v297_v25 = vand.u32 8388607, %v290_v17 }
  0x98   :  { %v677_v22 = vadd.s32 4294967169, %v139_v19  ;;  %v143_v23 = vor.u32 8388608, %v142_v20 }
  0x99   :  { %v680_v24 = vadd.s32 4294967169, %v294_v21  ;;  %v298_v30 = vor.u32 8388608, %v297_v25 }
  0x9a   :  { %v145_v26 = vadd.s32 1, %v677_v22  ;;  %v855_v29 = vshll.u32 %v143_v23, 8  ;;  %v873_v52 = vpop.f32.mrf.mxu2 }
  0x9b   :  { %v300_v27 = vadd.s32 1, %v680_v24  ;;  %v867_v47 = vshll.u32 %v298_v30, 8  ;;  %v448_v62 = vand.u32 2139095040, %v873_v52 }
  0x9c   :  { %vm146_vm1 = vcmp.gt.s32.totalorder %v145_v26, 0  ;;  %v184_v46 = vand.u32 65535, %v855_v29  ;;  %v185_v51 = vshrl.u32 %v855_v29, 16 }
  0x9d   :  { %v147_v28 = vsel %vm146_vm1, %v145_v26, 0  ;;  %vm301_vm2 = vcmp.gt.s32.totalorder %v300_v27, 0  ;;  %v913_v15 = vand.u32 65535, %v867_v47 }
  0x9e   :  { %v149_v31 = vand.u32 31, %v147_v28  ;;  %v302_v32 = vsel %vm301_vm2, %v300_v27, 0  ;;  %v857_v33 = vshrl.u32 %v147_v28, 5 }
  0x9f   :  { %v859_v34 = vand.u32 31, %v302_v32  ;;  %v919_v24 = vshrl.u32 %v302_v32, 5 }
  0xa0   :  { %v150_v35 = vsub.s32 32, %v149_v31  ;;  %v152_v37 = vshll.u32 %v806_v36, %v149_v31  ;;  %v155_v39 = vshll.u32 %v807_v38, %v149_v31  ;;  %v158_v41 = vshll.u32 %v808_v40, %v149_v31 }
  0xa1   :  { %v161_v43 = vshll.u32 %v809_v42, %v149_v31  ;;  %v164_v45 = vshll.u32 %v810_v44, %v149_v31  ;;  %vm167_vm3 = vcmp.lt.s32.totalorder %v857_v33, 1  ;;  %vm170_vm4 = vcmp.lt.s32.totalorder %v857_v33, 4 }
  0xa2   :  { %v153_v48 = vshrl.u32 %v807_v38, %v150_v35  ;;  %v156_v49 = vshrl.u32 %v808_v40, %v150_v35  ;;  %v159_v50 = vshrl.u32 %v809_v42, %v150_v35  ;;  %v162_v53 = vshrl.u32 %v810_v44, %v150_v35 }
  0xa3   :  { %v165_v55 = vshrl.u32 %v811_v54, %v150_v35  ;;  %v880_v59 = vsub.s32 32, %v859_v34  ;;  %vm169_vm5 = vcmp.lt.s32.totalorder %v857_v33, 3  ;;  %v151_v63 = vshrl.u32 %v806_v36, %v150_v35 }
  0xa4   :  { %v154_v56 = vor.u32 %v153_v48, %v152_v37  ;;  %v157_v57 = vor.u32 %v156_v49, %v155_v39  ;;  %v160_v58 = vor.u32 %v159_v50, %v158_v41  ;;  %v163_v60 = vor.u32 %v162_v53, %v161_v43 }
  0xa5   :  { %v166_v61 = vor.u32 %v165_v55, %v164_v45  ;;  %vm168_vm6 = vcmp.lt.s32.totalorder %v857_v33, 2  ;;  %v307_v4 = vshll.u32 %v806_v36, %v859_v34  ;;  %v310_v5 = vshll.u32 %v807_v38, %v859_v34 }
  0xa6   :  { %v175_v0 = vsel %vm167_vm3, %v154_v56, %v157_v57  ;;  %v179_v1 = vsel %vm167_vm3, %v157_v57, %v160_v58  ;;  %v176_v2 = vsel %vm170_vm4, %v163_v60, 920167782  ;;  %v172_v6 = vsel %vm170_vm4, %v160_v58, 2102212464 }
  0xa7   :  { %v180_v3 = vsel %vm170_vm4, %v166_v61, 1326507024  ;;  %v177_v7 = vsel %vm169_vm5, %v160_v58, %v176_v2  ;;  %v308_v9 = vshrl.u32 %v807_v38, %v880_v59  ;;  %v311_v12 = vshrl.u32 %v808_v40, %v880_v59 }
  0xa8   :  { %v181_v8 = vsel %vm169_vm5, %v163_v60, %v180_v3  ;;  %v178_v10 = vsel %vm168_vm6, %v175_v0, %v177_v7  ;;  %v171_v22 = vsel %vm167_vm3, %v151_v63, %v154_v56  ;;  %v173_v23 = vsel %vm169_vm5, %v157_v57, %v172_v6 }
  0xa9   :  { %v182_v11 = vsel %vm168_vm6, %v179_v1, %v181_v8  ;;  %v208_v20 = vand.u32 65535, %v178_v10  ;;  %v209_v21 = vshrl.u32 %v178_v10, 16  ;;  %v921_v25 = vor.u32 %v308_v9, %v307_v4 }
  0xaa   :  { %v186_v18 = vand.u32 65535, %v182_v11  ;;  %v187_v19 = vshrl.u32 %v182_v11, 16  ;;  %v923_v28 = vor.u32 %v311_v12, %v310_v5  ;;  %v313_v30 = vshll.u32 %v808_v40, %v859_v34 }
  0xab   :  { %v211_v35 = vmul.u32 %v209_v21, %v184_v46  ;;  %v212_v37 = vmul.u32 %v208_v20, %v185_v51  ;;  %v314_v39 = vshrl.u32 %v809_v42, %v880_v59  ;;  %v210_v45 = vmul.u32 %v208_v20, %v184_v46 }
  0xac   :  { %v189_v26 = vmul.u32 %v187_v19, %v184_v46  ;;  %v190_v27 = vmul.u32 %v186_v18, %v185_v51  ;;  %v188_v31 = vmul.u32 %v186_v18, %v184_v46  ;;  %v191_v41 = vmul.u32 %v187_v19, %v185_v51 }
  0xad   :  { %v213_v32 = vmul.u32 %v209_v21, %v185_v51  ;;  %v214_v53 = vshll.u32 %v211_v35, 16  ;;  %v216_v56 = vshll.u32 %v212_v37, 16  ;;  %v316_v57 = vshll.u32 %v809_v42, %v859_v34 }
  0xae   :  { %v192_v43 = vshll.u32 %v189_v26, 16  ;;  %v193_v48 = vshrl.u32 %v189_v26, 16  ;;  %v194_v49 = vshll.u32 %v190_v27, 16  ;;  %v195_v50 = vshrl.u32 %v190_v27, 16 }
  0xaf   :  { %v812_v58 = vmov 0   ;;  %vm218_vm8 = vc.u32 %v210_v45, %v214_v53  ;;  %v220_v61 = vadd.s32 %v214_v53, %v210_v45  ;;  %v317_v63 = vshrl.u32 %v810_v44, %v880_v59 }
  0xb0   :  { %vm196_vm7 = vc.u32 %v188_v31, %v192_v43  ;;  %v198_v55 = vadd.s32 %v192_v43, %v188_v31  ;;  %v219_v51 = vsel %vm218_vm8, 1, %v812_v58  ;;  %v319_v0 = vshll.u32 %v810_v44, %v859_v34 }
  0xb1   :  { %v197_v60 = vsel %vm196_vm7, 1, %v812_v58  ;;  %v221_v2 = vadd.s32 %v219_v51, %v213_v32  ;;  %vm222_vm10 = vc.u32 %v220_v61, %v216_v56  ;;  %v938_v3 = vor.u32 %v314_v39, %v313_v30 }
  0xb2   :  { %v199_v46 = vadd.s32 %v197_v60, %v191_v41  ;;  %vm200_vm9 = vc.u32 %v198_v55, %v194_v49  ;;  %v223_v5 = vsel %vm222_vm10, 1, %v812_v58  ;;  %v318_v6 = vor.u32 %v317_v63, %v316_v57 }
  0xb3   :  { %v201_v1 = vsel %vm200_vm9, 1, %v812_v58  ;;  %v320_v7 = vshrl.u32 %v811_v54, %v880_v59  ;;  %v215_v8 = vshrl.u32 %v211_v35, 16  ;;  %v225_v9 = vadd.s32 %v223_v5, %v221_v2 }
  0xb4   :  { %v203_v4 = vadd.s32 %v201_v1, %v199_v46  ;;  %vm322_vm11 = vcmp.lt.s32.totalorder %v919_v24, 1  ;;  %vm324_vm12 = vcmp.lt.s32.totalorder %v919_v24, 3  ;;  %v217_v10 = vshrl.u32 %v212_v37, 16 }
  0xb5   :  { %v321_v11 = vor.u32 %v320_v7, %v319_v0  ;;  %vm325_vm13 = vcmp.lt.s32.totalorder %v919_v24, 4  ;;  %v946_v12 = vadd.s32 %v220_v61, %v216_v56  ;;  %v226_v18 = vadd.s32 %v225_v9, %v215_v8 }
  0xb6   :  { %v204_v34 = vadd.s32 %v203_v4, %v193_v48  ;;  %v330_v19 = vsel %vm322_vm11, %v921_v25, %v923_v28  ;;  %v331_v20 = vsel %vm325_vm13, %v318_v6, 920167782  ;;  %vm323_vm14 = vcmp.lt.s32.totalorder %v919_v24, 2 }
  0xb7   :  { %v332_v26 = vsel %vm324_vm12, %v938_v3, %v331_v20  ;;  %v334_v27 = vsel %vm322_vm11, %v923_v28, %v938_v3  ;;  %v174_v30 = vsel %vm168_vm6, %v171_v22, %v173_v23  ;;  %v227_v31 = vadd.s32 %v226_v18, %v217_v10 }
  0xb8   :  { %v954_v21 = vadd.s32 %v204_v34, %v195_v50  ;;  %v333_v35 = vsel %vm323_vm14, %v330_v19, %v332_v26  ;;  %v335_v37 = vsel %vm325_vm13, %v321_v11, 1326507024  ;;  %v340_v41 = vshrl.u32 %v867_v47, 16 }
  0xb9   :  { %v336_v39 = vsel %vm324_vm12, %v318_v6, %v335_v37  ;;  %v363_v43 = vand.u32 65535, %v333_v35  ;;  %v231_v45 = vadd.s32 1, %v227_v31  ;;  %v364_v22 = vshrl.u32 %v333_v35, 16 }
  0xba   :  { %vm230_vm15 = vc.u32 %v954_v21, %v946_v12  ;;  %v337_v33 = vsel %vm323_vm14, %v334_v27, %v336_v39  ;;  %v449_v23 = vshrl.u32 %v448_v62, 23  ;;  %v228_v32 = vmul.u32 %v855_v29, %v174_v30 }
  0xbb   :  { %v341_v48 = vand.u32 65535, %v337_v33  ;;  %v342_v49 = vshrl.u32 %v337_v33, 16  ;;  %v232_v50 = vsel %vm230_vm15, %v231_v45, %v227_v31  ;;  %v366_v53 = vmul.u32 %v364_v22, %v913_v15 }
  0xbc   :  { %v367_v55 = vmul.u32 %v363_v43, %v340_v41  ;;  %v233_v56 = vadd.s32 %v232_v50, %v228_v32  ;;  %v365_v61 = vmul.u32 %v363_v43, %v913_v15  ;;  %v368_v63 = vmul.u32 %v364_v22, %v340_v41 }
  0xbd   :  { %v344_v57 = vmul.u32 %v342_v49, %v913_v15  ;;  %v345_v60 = vmul.u32 %v341_v48, %v340_v41  ;;  %v369_v46 = vshll.u32 %v366_v53, 16  ;;  %v683_v51 = vadd.s32 4294967169, %v449_v23 }
  0xbe   :  { %v234_v0 = vadd.s32 536870912, %v233_v56  ;;  %v343_v62 = vmul.u32 %v341_v48, %v913_v15  ;;  %v346_v1 = vmul.u32 %v342_v49, %v340_v41  ;;  %v371_v4 = vshll.u32 %v367_v55, 16 }
  0xbf   :  { %v347_v29 = vshll.u32 %v344_v57, 16  ;;  %v349_v2 = vshll.u32 %v345_v60, 16  ;;  %vm373_vm0 = vc.u32 %v365_v61, %v369_v46  ;;  %v375_v5 = vadd.s32 %v369_v46, %v365_v61 }
  0xc0   :  { %v235_v6 = vshrl.u32 %v234_v0, 30  ;;  %v374_v8 = vsel %vm373_vm0, 1, %v812_v58  ;;  %v306_v9 = vshrl.u32 %v806_v36, %v880_v59  ;;  %v327_v15 = vsel %vm325_vm13, %v938_v3, 2102212464 }
  0xc1   :  { %vm351_vm1 = vc.u32 %v343_v62, %v347_v29  ;;  %v353_v7 = vadd.s32 %v347_v29, %v343_v62  ;;  %v376_v10 = vadd.s32 %v374_v8, %v368_v63  ;;  %vm377_vm2 = vc.u32 %v375_v5, %v371_v4 }
  0xc2   :  { %v352_v34 = vsel %vm351_vm1, 1, %v812_v58  ;;  %v236_v11 = vshll.u32 %v235_v6, 30  ;;  %v378_v20 = vsel %vm377_vm2, 1, %v812_v58  ;;  %v445_v26 = vand.u32 2147483647, %v873_v52 }
  0xc3   :  { %v354_v18 = vadd.s32 %v352_v34, %v346_v1  ;;  %vm355_vm3 = vc.u32 %v353_v7, %v349_v2  ;;  %v455_v27 = vadd.s32 1, %v683_v51  ;;  %v348_v59 = vshrl.u32 %v344_v57, 16 }
  0xc4   :  { %v356_v19 = vsel %vm355_vm3, 1, %v812_v58  ;;  %v237_v30 = vsub.s32 %v233_v56, %v236_v11  ;;  %v380_v35 = vadd.s32 %v378_v20, %v376_v10  ;;  %v326_v37 = vsel %vm322_vm11, %v306_v9, %v921_v25 }
  0xc5   :  { %v358_v31 = vadd.s32 %v356_v19, %v354_v18  ;;  %v328_v3 = vsel %vm324_vm12, %v923_v28, %v327_v15  ;;  %v370_v39 = vshrl.u32 %v366_v53, 16  ;;  %vm456_vm4 = vcmp.gt.s32.totalorder %v455_v27, 0 }
  0xc6   :  { %vm238_vm5 = vcmp.lt.s32.totalorder %v237_v30, 0  ;;  %v239_v41 = vsub.s32 0, %v237_v30  ;;  %v350_v43 = vshrl.u32 %v345_v60, 16  ;;  %v372_v33 = vshrl.u32 %v367_v55, 16 }
  0xc7   :  { %v359_v45 = vadd.s32 %v358_v31, %v348_v59  ;;  %v381_v22 = vadd.s32 %v380_v35, %v370_v39  ;;  %v457_v23 = vsel %vm456_vm4, %v455_v27, 0  ;;  %v259_v48 = vsub.s32 4, %v235_v6 }
  0xc8   :  { %v240_v32 = vsel %vm238_vm5, %v239_v41, %v237_v30  ;;  %v329_v49 = vsel %vm323_vm14, %v326_v37, %v328_v3  ;;  %v1004_v56 = vadd.s32 %v375_v5, %v371_v4  ;;  %v459_v53 = vand.u32 31, %v457_v23 }
  0xc9   :  { %v1002_v50 = vadd.s32 %v359_v45, %v350_v43  ;;  %v241_v25 = vclz %v240_v32  ;;  %v382_v28 = vadd.s32 %v381_v22, %v372_v33  ;;  %vm137_vm6 = vcmp.lt.s32.totalorder %v843_v13, 0 }
  0xca   :  { %v229_v57 = vadd.s32 %v946_v12, %v954_v21  ;;  %v452_v55 = vand.u32 8388607, %v445_v26  ;;  %v1013_v61 = vsub.s32 32, %v459_v53  ;;  %v260_v63 = vsel %vm137_vm6, %v259_v48, %v235_v6 }
  0xcb   :  { %v678_v60 = vadd.s32 4294967294, %v241_v25  ;;  %vm385_vm7 = vc.u32 %v1002_v50, %v1004_v56  ;;  %v386_v24 = vadd.s32 1, %v382_v28  ;;  %v383_v46 = vmul.u32 %v867_v47, %v329_v49 }
  0xcc   :  { %v1018_v51 = vshrl.u32 %v457_v23, 5  ;;  %v462_v0 = vshll.u32 %v806_v36, %v459_v53  ;;  %v463_v21 = vshrl.u32 %v807_v38, %v1013_v61  ;;  %v465_v62 = vshll.u32 %v807_v38, %v459_v53 }
  0xcd   :  { %vm679_vm8 = vcmp.lt.s32.totalorder %v678_v60, 0  ;;  %v387_v12 = vsel %vm385_vm7, %v386_v24, %v382_v28  ;;  %v466_v2 = vshrl.u32 %v808_v40, %v1013_v61  ;;  %v468_v4 = vshll.u32 %v808_v40, %v459_v53 }
  0xce   :  { %v244_v1 = vsel %vm679_vm8, 0, %v678_v60  ;;  %v388_v29 = vadd.s32 %v387_v12, %v383_v46  ;;  %v469_v6 = vshrl.u32 %v809_v42, %v1013_v61  ;;  %v471_v7 = vshll.u32 %v809_v42, %v459_v53 }
  0xcf   :  { %v245_v5 = vsub.s32 32, %v244_v1  ;;  %v249_v47 = vsub.s32 4294967266, %v244_v1  ;;  %v246_v8 = vshll.u32 %v237_v30, %v244_v1  ;;  %v1030_v34 = vor.u32 %v463_v21, %v462_v0 }
  0xd0   :  { %v389_v9 = vadd.s32 536870912, %v388_v29  ;;  %v472_v38 = vshrl.u32 %v810_v44, %v1013_v61  ;;  %v1034_v15 = vor.u32 %v466_v2, %v465_v62  ;;  %v475_v40 = vshrl.u32 %v811_v54, %v1013_v61 }
  0xd1   :  { %v247_v10 = vshrl.u32 %v229_v57, %v245_v5  ;;  %v250_v11 = vadd.s32 127, %v249_v47  ;;  %vm1040_vm9 = vcmp.le.f32.partialorder %v135_v14, 0.7853982  ;;  %v453_v19 = vor.u32 8388608, %v452_v55 }
  0xd2   :  { %v1044_v42 = vshrl.u32 %v389_v9, 30  ;;  %v473_v20 = vor.u32 %v472_v38, %v471_v7  ;;  %v470_v59 = vor.u32 %v469_v6, %v468_v4  ;;  %v474_v31 = vshll.u32 %v810_v44, %v459_v53 }
  0xd3   :  { %v248_v27 = vor.u32 %v247_v10, %v246_v8  ;;  %v251_v30 = vshll.u32 %v250_v11, 23  ;;  %v262_v35 = vsel %vm1040_vm9, 0, %v260_v63  ;;  %vm477_vm10 = vcmp.lt.s32.totalorder %v1018_v51, 1 }
  0xd4   :  { %v391_v54 = vshll.u32 %v1044_v42, 30  ;;  %v476_v37 = vor.u32 %v475_v40, %v474_v31  ;;  %vm480_vm11 = vcmp.lt.s32.totalorder %v1018_v51, 4  ;;  %v485_v3 = vsel %vm477_vm10, %v1030_v34, %v1034_v15 }
  0xd5   :  { %v252_v14 = vor.u32 4788187, %v251_v30  ;;  %vm479_vm12 = vcmp.lt.s32.totalorder %v1018_v51, 3  ;;  %v486_v44 = vsel %vm480_vm11, %v473_v20, 920167782  ;;  %v1059_v41 = vshll.u32 %v453_v19, 8 }
  0xd6   :  { %v392_v39 = vsub.s32 %v388_v29, %v391_v54  ;;  %v255_v45 = vcvt.s32.f32 %v248_v27  ;;  %vm478_vm13 = vcmp.lt.s32.totalorder %v1018_v51, 2  ;;  %v487_v33 = vsel %vm479_vm12, %v470_v59, %v486_v44 }
  0xd7   :  { %v253_v43 = vand.u32 2147483647, %v252_v14  ;;  %v279_v22 = vadd.s32 3, %v262_v35  ;;  %v488_v32 = vsel %vm478_vm13, %v485_v3, %v487_v33  ;;  %v489_v49 = vsel %vm477_vm10, %v1034_v15, %v470_v59 }
  0xd8   :  { %vm393_vm14 = vcmp.lt.s32.totalorder %v392_v39, 0  ;;  %v394_v23 = vsub.s32 0, %v392_v39  ;;  %v490_v25 = vsel %vm480_vm11, %v476_v37, 1326507024  ;;  %v494_v57 = vand.u32 65535, %v1059_v41 }
  0xd9   :  { %v256_v48 = vmul.f32 %v255_v45, %v253_v43  ;;  %v491_v53 = vsel %vm479_vm12, %v473_v20, %v490_v25  ;;  %v518_v63 = vand.u32 65535, %v488_v32  ;;  %v1076_v46 = vand.u32 3, %v279_v22 }
  0xda   :  { %v395_v28 = vsel %vm393_vm14, %v394_v23, %v392_v39  ;;  %v492_v24 = vsel %vm478_vm13, %v489_v49, %v491_v53  ;;  %v495_v0 = vshrl.u32 %v1059_v41, 16  ;;  %v519_v21 = vshrl.u32 %v488_v32, 16 }
  0xdb   :  { %v257_v55 = vxor.u32 2147483648, %v256_v48  ;;  %v396_v60 = vclz %v395_v28  ;;  %v496_v12 = vand.u32 65535, %v492_v24  ;;  %v384_v1 = vadd.s32 %v1004_v56, %v1002_v50 }
  0xdc   :  { %v497_v2 = vshrl.u32 %v492_v24, 16  ;;  %v461_v5 = vshrl.u32 %v806_v36, %v1013_v61  ;;  %v1090_v47 = vsel %vm480_vm11, %v470_v59, 2102212464  ;;  %v520_v9 = vmul.u32 %v518_v63, %v494_v57 }
  0xdd   :  { %v258_v62 = vsel %vm137_vm6, %v257_v55, %v256_v48  ;;  %v681_v29 = vadd.s32 4294967294, %v396_v60  ;;  %v1092_v6 = vmul.u32 %v496_v12, %v495_v0  ;;  %v498_v56 = vmul.u32 %v496_v12, %v494_v57 }
  0xde   :  { %v261_v4 = vsel %vm1040_vm9, %v843_v13, %v258_v62  ;;  %v499_v8 = vmul.u32 %v497_v2, %v494_v57  ;;  %v521_v38 = vmul.u32 %v519_v21, %v494_v57  ;;  %v1094_v10 = vmul.u32 %v518_v63, %v495_v0 }
  0xdf   :  { %v263_v7 = vmul.f32 %v261_v4, %v261_v4  ;;  %vm682_vm15 = vcmp.lt.s32.totalorder %v681_v29, 0  ;;  %v501_v19 = vmul.u32 %v497_v2, %v495_v0  ;;  %v504_v20 = vshll.u32 %v1092_v6, 16 }
  0xe0   :  { %v399_v50 = vsel %vm682_vm15, 0, %v681_v29  ;;  %v502_v61 = vshll.u32 %v499_v8, 16  ;;  %v523_v27 = vmul.u32 %v519_v21, %v495_v0  ;;  %v524_v37 = vshll.u32 %v521_v38, 16 }
  0xe1   :  { %v264_v11 = vmul.f32 -0.001358992, %v263_v7  ;;  %v271_v40 = vmul.f32 -0.00019511016, %v263_v7  ;;  %v400_v18 = vsub.s32 32, %v399_v50  ;;  %v404_v36 = vsub.s32 4294967266, %v399_v50 }
  0xe2   :  { %v401_v31 = vshll.u32 %v392_v39, %v399_v50  ;;  %vm506_vm0 = vc.u32 %v498_v56, %v502_v61  ;;  %v508_v14 = vadd.s32 %v502_v61, %v498_v56  ;;  %v503_v22 = vshrl.u32 %v499_v8, 16 }
  0xe3   :  { %v265_v30 = vadd.f32 0.041655596, %v264_v11  ;;  %v272_v59 = vadd.f32 0.008332121, %v271_v40  ;;  %v402_v35 = vshrl.u32 %v384_v1, %v400_v18  ;;  %v405_v54 = vadd.s32 127, %v404_v36 }
  0xe4   :  { %v507_v45 = vsel %vm506_vm0, 1, %v812_v58  ;;  %vm510_vm1 = vc.u32 %v508_v14, %v504_v20  ;;  %vm292_vm2 = vcmp.lt.s32.totalorder %v847_v16, 0  ;;  %v526_v49 = vshll.u32 %v1094_v10, 16 }
  0xe5   :  { %v266_v3 = vmul.f32 %v265_v30, %v263_v7  ;;  %v273_v44 = vmul.f32 %v272_v59, %v263_v7  ;;  %v403_v43 = vor.u32 %v402_v35, %v401_v31  ;;  %v406_v33 = vshll.u32 %v405_v54, 23 }
  0xe6   :  { %v509_v23 = vadd.s32 %v507_v45, %v501_v19  ;;  %v511_v39 = vsel %vm510_vm1, 1, %v812_v58  ;;  %vm1103_vm3 = vcmp.le.f32.partialorder %v290_v17, 0.7853982  ;;  %vm528_vm4 = vc.u32 %v520_v9, %v524_v37 }
  0xe7   :  { %v267_v32 = vadd.f32 -0.4999988, %v266_v3  ;;  %v274_v48 = vadd.f32 -0.16666654, %v273_v44  ;;  %v407_v28 = vor.u32 4788187, %v406_v33  ;;  %v530_v57 = vadd.s32 %v524_v37, %v520_v9 }
  0xe8   :  { %v513_v53 = vadd.s32 %v511_v39, %v509_v23  ;;  %v410_v24 = vcvt.s32.f32 %v403_v43  ;;  %v529_v63 = vsel %vm528_vm4, 1, %v812_v58  ;;  %v505_v17 = vshrl.u32 %v1092_v6, 16 }
  0xe9   :  { %v268_v55 = vmul.f32 %v267_v32, %v263_v7  ;;  %v275_v60 = vmul.f32 %v274_v48, %v263_v7  ;;  %v408_v0 = vand.u32 2147483647, %v407_v28  ;;  %v531_v21 = vadd.s32 %v529_v63, %v523_v27 }
  0xea   :  { %v514_v12 = vadd.s32 %v513_v53, %v503_v22  ;;  %vm532_vm5 = vc.u32 %v530_v57, %v526_v49  ;;  %v481_v8 = vsel %vm477_vm10, %v461_v5, %v1030_v34  ;;  %v525_v9 = vshrl.u32 %v521_v38, 16 }
  0xeb   :  { %v269_v62 = vadd.f32 1.0, %v268_v55  ;;  %v276_v1 = vadd.f32 1.0, %v275_v60  ;;  %v533_v29 = vsel %vm532_vm5, 1, %v812_v58  ;;  %v411_v2 = vmul.f32 %v410_v24, %v408_v0 }
  0xec   :  { %v535_v7 = vadd.s32 %v533_v29, %v531_v21  ;;  %v483_v11 = vsel %vm479_vm12, %v1034_v15, %v1090_v47  ;;  %v1117_v40 = vadd.s32 %v514_v12, %v505_v17  ;;  %vm281_vm6 = vcmp.lt.s32.totalorder %v1076_v46, 2 }
  0xed   :  { %v277_v50 = vmul.f32 %v276_v1, %v261_v4  ;;  %v286_v56 = vxor.u32 2147483648, %v269_v62  ;;  %v412_v6 = vxor.u32 2147483648, %v411_v2  ;;  %v527_v58 = vshrl.u32 %v1094_v10, 16 }
  0xee   :  { %v536_v18 = vadd.s32 %v535_v7, %v525_v9  ;;  %vm282_vm7 = vcmp.eq.s32.totalorder %v1076_v46, 0  ;;  %vm285_vm8 = vcmp.eq.s32.totalorder %v1076_v46, 2  ;;  %v534_v4 = vadd.s32 %v530_v57, %v526_v49 }
  0xef   :  { %v283_v34 = vxor.u32 2147483648, %v277_v50  ;;  %v413_v5 = vsel %vm292_vm2, %v412_v6, %v411_v2  ;;  %v414_v38 = vsub.s32 4, %v1044_v42  ;;  %v484_v15 = vsel %vm478_vm13, %v481_v8, %v483_v11 }
  0xf0   :  { %v537_v47 = vadd.s32 %v536_v18, %v527_v58  ;;  %v287_v36 = vsel %vm285_vm8, %v286_v56, %v277_v50  ;;  %v416_v10 = vsel %vm1103_vm3, %v847_v16, %v413_v5  ;;  %vm540_vm9 = vc.u32 %v1117_v40, %v534_v4 }
  0xf1   :  { %v284_v19 = vsel %vm282_vm7, %v269_v62, %v283_v34  ;;  %vm278_vm10 = vweird.f32 %v843_v13  ;;  %v418_v20 = vmul.f32 %v416_v10, %v416_v10  ;;  %v538_v51 = vmul.u32 %v1059_v41, %v484_v15 }
  0xf2   :  { %v288_v61 = vsel %vm281_vm6, %v284_v19, %v287_v36  ;;  %v541_v27 = vadd.s32 1, %v537_v47  ;;  %v415_v54 = vsel %vm292_vm2, %v414_v38, %v1044_v42  ;;  %vm433_vm15 = vweird.f32 %v847_v16 }
  0xf3   :  { %v289_v30 = vsel %vm278_vm10, nan, %v288_v61  ;;  %v419_v59 = vmul.f32 -0.001358992, %v418_v20  ;;  %v426_v31 = vmul.f32 -0.00019511016, %v418_v20  ;;  %v417_v46 = vsel %vm1103_vm3, 0, %v415_v54 }
  0xf4   :  { %600 = vst [vmem:[#allocation8] sm:$0xff] %v289_v30  ;;  %v542_v35 = vsel %vm540_vm9, %v541_v27, %v537_v47  ;;  %v434_v22 = vadd.s32 3, %v417_v46  ;;  %v539_v17 = vadd.s32 %v534_v4, %v1117_v40  ;;  %vm447_vm1 = vcmp.lt.s32.totalorder %v873_v52, 0 }
  0xf5   :  { %v543_v14 = vadd.s32 %v542_v35, %v538_v51  ;;  %v420_v37 = vadd.f32 0.041655596, %v419_v59  ;;  %v427_v3 = vadd.f32 0.008332121, %v426_v31  ;;  %vm446_vm2 = vcmp.le.f32.partialorder %v445_v26, 0.7853982 }
  0xf6   :  { %v435_v42 = vand.u32 3, %v434_v22  ;;  %vm588_vm6 = vweird.f32 %v873_v52  ;;  %v622_v22 = vld [vmem:[#allocation7] sm:$0x7]  ;;  %vm645_vm8 = vcmask 1040384   ;;  %vm647_vm9 = vcmask 1041408  }
  0xf7   :  { %v544_v13 = vadd.s32 536870912, %v543_v14  ;;  %v421_v44 = vmul.f32 %v420_v37, %v418_v20  ;;  %v428_v43 = vmul.f32 %v427_v3, %v418_v20 }
  0xf8   :  { %vm437_vm12 = vcmp.eq.s32.totalorder %v435_v42, 0  ;;  %vm440_vm13 = vcmp.eq.s32.totalorder %v435_v42, 2  ;;  %vm436_vm14 = vcmp.lt.s32.totalorder %v435_v42, 2 }
  0xf9   :  { %v545_v45 = vshrl.u32 %v544_v13, 30  ;;  %v422_v33 = vadd.f32 -0.4999988, %v421_v44  ;;  %v429_v41 = vadd.f32 -0.16666654, %v428_v43  ;;  %v607_v13 = vlaneseq }
  0xfb   :  { %v546_v23 = vshll.u32 %v545_v45, 30  ;;  %v423_v32 = vmul.f32 %v422_v33, %v418_v20  ;;  %v430_v48 = vmul.f32 %v429_v41, %v418_v20  ;;  %v569_v5 = vsub.s32 4, %v545_v45 }
  0xfc   :  { %v608_v33 = vand.u32 127, %v607_v13  ;;  %vm652_vm10 = vcmp.lt.s32.totalorder %v607_v13, 384 }
  0xfd   :  { %v547_v39 = vsub.s32 %v543_v14, %v546_v23  ;;  %v424_v49 = vadd.f32 1.0, %v423_v32  ;;  %v431_v28 = vadd.f32 1.0, %v430_v48  ;;  %v570_v47 = vsel %vm447_vm1, %v569_v5, %v545_v45 }
  0xfe   :  { %v610_v41 = vadd.s32 256, %v608_v33  ;;  %v626_v23 = vperm.slane %v622_v22, 2 }
  0xff   :  { %vm548_vm11 = vcmp.lt.s32.totalorder %v547_v39, 0  ;;  %v549_v53 = vsub.s32 0, %v547_v39  ;;  %v432_v57 = vmul.f32 %v431_v28, %v416_v10  ;;  %v441_v55 = vxor.u32 2147483648, %v424_v49 }
 0x100   :  { %v572_v10 = vsel %vm446_vm2, 0, %v570_v47  ;;  %vm613_vm7 = vcmp.ge.s32.totalorder %v610_v41, 336 }
 0x101   :  { %v550_v60 = vsel %vm548_vm11, %v549_v53, %v547_v39  ;;  %v438_v25 = vxor.u32 2147483648, %v432_v57  ;;  %v442_v0 = vsel %vm440_vm13, %v441_v55, %v432_v57  ;;  %v589_v51 = vadd.s32 3, %v572_v10 }
 0x102   :  { %v551_v24 = vclz %v550_v60 }
 0x103   :  { %v439_v63 = vsel %vm437_vm12, %v424_v49, %v438_v25  ;;  %v590_v54 = vand.u32 3, %v589_v51 }
 0x104   :  { %v684_v12 = vadd.s32 4294967294, %v551_v24  ;;  %v443_v21 = vsel %vm436_vm14, %v439_v63, %v442_v0 }
 0x105   :  { %v444_v62 = vsel %vm433_vm15, nan, %v443_v21  ;;  %vm592_vm3 = vcmp.eq.s32.totalorder %v590_v54, 0  ;;  %vm595_vm4 = vcmp.eq.s32.totalorder %v590_v54, 2  ;;  %vm591_vm5 = vcmp.lt.s32.totalorder %v590_v54, 2 }
 0x106   :  { %vm685_vm0 = vcmp.lt.s32.totalorder %v684_v12, 0  ;;  %601 = vst [vmem:[#allocation8 + $0x8] sm:$0xff] %v444_v62 }
 0x107   :  { %v554_v1 = vsel %vm685_vm0, 0, %v684_v12 }
 0x108   :  { %v555_v29 = vsub.s32 32, %v554_v1  ;;  %v559_v2 = vsub.s32 4294967266, %v554_v1  ;;  %v556_v8 = vshll.u32 %v547_v39, %v554_v1 }
 0x10a   :  { %v557_v9 = vshrl.u32 %v539_v17, %v555_v29  ;;  %v560_v7 = vadd.s32 127, %v559_v2 }
 0x10c   :  { %v558_v50 = vor.u32 %v557_v9, %v556_v8  ;;  %v561_v56 = vshll.u32 %v560_v7, 23 }
 0x10e   :  { %v562_v11 = vor.u32 4788187, %v561_v56  ;;  %v565_v58 = vcvt.s32.f32 %v558_v50 }
 0x110   :  { %v563_v6 = vand.u32 2147483647, %v562_v11 }
 0x112   :  { %v566_v18 = vmul.f32 %v565_v58, %v563_v6 }
 0x114   :  { %v567_v34 = vxor.u32 2147483648, %v566_v18 }
 0x116   :  { %v568_v16 = vsel %vm447_vm1, %v567_v34, %v566_v18 }
 0x117   :  { %v571_v40 = vsel %vm446_vm2, %v873_v52, %v568_v16 }
 0x118   :  { %v573_v4 = vmul.f32 %v571_v40, %v571_v40 }
 0x11a   :  { %v574_v38 = vmul.f32 -0.001358992, %v573_v4  ;;  %v581_v15 = vmul.f32 -0.00019511016, %v573_v4 }
 0x11c   :  { %v575_v19 = vadd.f32 0.041655596, %v574_v38  ;;  %v582_v36 = vadd.f32 0.008332121, %v581_v15 }
 0x11e   :  { %v576_v61 = vmul.f32 %v575_v19, %v573_v4  ;;  %v583_v20 = vmul.f32 %v582_v36, %v573_v4 }
 0x120   :  { %v577_v27 = vadd.f32 -0.4999988, %v576_v61  ;;  %v584_v30 = vadd.f32 -0.16666654, %v583_v20 }
 0x122   :  { %v578_v59 = vmul.f32 %v577_v27, %v573_v4  ;;  %v585_v31 = vmul.f32 %v584_v30, %v573_v4 }
 0x124   :  { %v579_v35 = vadd.f32 1.0, %v578_v59  ;;  %v586_v26 = vadd.f32 1.0, %v585_v31 }
 0x126   :  { %v587_v14 = vmul.f32 %v586_v26, %v571_v40  ;;  %v596_v37 = vxor.u32 2147483648, %v579_v35 }
 0x128   :  { %v593_v3 = vxor.u32 2147483648, %v587_v14  ;;  %v597_v44 = vsel %vm595_vm4, %v596_v37, %v587_v14 }
 0x12a   :  { %v594_v46 = vsel %vm592_vm3, %v579_v35, %v593_v3 }
 0x12b   :  { %v598_v43 = vsel %vm591_vm5, %v594_v46, %v597_v44 }
 0x12c   :  { %v599_v45 = vsel %vm588_vm6, nan, %v598_v43 }
 0x12d   :  { %602 = vst [vmem:[#allocation8 + $0x10] sm:$0xff] %v599_v45 }
 0x134   :  { %v621_v32 = vld [vmem:[#allocation8 + $0x7] ss:$8 sm:$0x7] }
 0x135   :  { %v632_v48 = vperm.slane %v621_v32, 1  ;;  %v633_v39 = vperm.slane %v621_v32, 2  ;;  %v631_v49 = vperm.slane %v621_v32, 0 }
 0x137   :  { %v639_v52 = vsel %vm613_vm7, %v626_v23, %v633_v39  ;;  %v643_v28 = vrot.slane %v632_v48, 7 }
 0x138   :  { %v644_v42 = vrot.slane %v639_v52, 6 }
 0x139   :  { %v646_v53 = vsel %vm645_vm8, %v631_v49, %v643_v28 }
 0x13a   :  { %v648_v57 = vsel %vm647_vm9, %v646_v53, %v644_v42 }
 0x13b   :  { %654 = vst.msk [vmem:[#allocation8 + $0x7] ss:$8 sm:$0x7] %vm652_vm10, %v648_v57 }
 0x13c   :  { %666 = dma.vmem_to_hbm [thread:$0]  %s662_s2, 384, %s664_s30, [#allocation4]  }
 0x13d   :  { %799 = dma.done.wait [#allocation4], 384  }
 0x13e   :  { %800 = vsyncadd [#allocation4], 4294966912 }
 0x13f   :  { %671 = vsyncpa [#allocation3], 1 }
 0x140   :  { %672 = vsyncpa [#allocation6], 1 }
 0x141   :  { %673 = vsyncpa [#allocation4], 1 }

</bundles_post_ra>
